<compile_context>
chip_gen: v5e
topology: v5e:2x2
jax: 0.10.0
libtpu: 0.0.40
codegen_flags: <defaults>
</compile_context>

<pallas_src>
import functools
import math

import jax
import jax.numpy as jnp
from jax.experimental import pallas as pl
from jax.experimental.pallas import tpu as pltpu


# ---------------------------------------------------------------------------
# Kernel: fused  y = (x @ Wv + bv) * gate * 0.5*(1 + erf(gate / sqrt(2)))
# ---------------------------------------------------------------------------
_INV_SQRT2 = float(1.0 / math.sqrt(2.0))

# Abramowitz & Stegun 7.1.26 coefficients pre-multiplied by 0.5 so that
#   q(|z|) = poly(t) * exp(-z^2) = 0.5 * (1 - erf(|z|)),   t = 1 / (1 + p*|z|)
_P = 0.3275911
_A1 = 0.5 * 0.254829592
_A2 = 0.5 * -0.284496736
_A3 = 0.5 * 1.421413741
_A4 = 0.5 * -1.453152027
_A5 = 0.5 * 1.061405429


def _geglu_kernel(x_ref, wv_ref, wg_ref, bv_ref, bg_ref, o_ref, *,
                  approx_recip: bool):
    x = x_ref[...]
    # Two MXU matmuls sharing the same LHS; native (bf16) inputs, f32 accum.
    val = jnp.dot(x, wv_ref[...], preferred_element_type=jnp.float32)
    gate = jnp.dot(x, wg_ref[...], preferred_element_type=jnp.float32)
    val = val + bv_ref[...]            # (tm, tn) f32
    gate = gate + bg_ref[...]          # (tm, tn) f32

    # 0.5*(1 + erf(gate/sqrt(2))) with the 0.5 folded into the polynomial and
    # the odd-symmetry sign flip folded into a single select:
    #   q = 0.5*(1 - erf(|z|));   result = gate >= 0 ? 1 - q : q
    z = gate * _INV_SQRT2
    az = jnp.abs(z)
    denom = 1.0 + _P * az
    if approx_recip:                   # EUP slot; ~1e-4 erf error (bf16 out)
        t = pl.reciprocal(denom, approx=True)
    else:                              # exact divide: |erf err| <= 1.5e-7
        t = 1.0 / denom
    poly = ((((_A5 * t + _A4) * t + _A3) * t + _A2) * t + _A1) * t
    q = poly * jnp.exp(-az * az)
    half_one_plus_erf = jnp.where(gate >= 0.0, 1.0 - q, q)

    o_ref[...] = (val * gate * half_one_plus_erf).astype(o_ref.dtype)


def _round_up(v: int, m: int) -> int:
    return ((v + m - 1) // m) * m


def geglu_pallas(x, w, b, *, block_rows: int = 256, mxu_dtype=jnp.bfloat16,
                 vmem_budget_bytes: int = 40 * 1024 * 1024):
    """GeGLU forward.

    x: (..., in_dim)
    w: (in_dim, 2*out_dim)  (value half first, gate half second — matches
                             torch's .chunk(2, dim=-1) on the Linear output)
    b: (2*out_dim,)
    returns (..., out_dim) in x.dtype
    """
    in_dim = x.shape[-1]
    out_dim = w.shape[1] // 2
    lead = x.shape[:-1]
    out_dtype = x.dtype

    rows = 1
    for d in lead:
        rows *= d
    x2 = x.reshape(rows, in_dim)

    # ---- host-side (one-time) weight prep --------------------------------
    # Split into value / gate halves, pad out_dim up to a multiple of 128 so
    # the kernel's stores are lane-dense, cast MXU operands to the MXU dtype.
    out_p = _round_up(out_dim, 128)
    wv = w[:, :out_dim]
    wg = w[:, out_dim:]
    bv = b[:out_dim].reshape(1, out_dim).astype(jnp.float32)
    bg = b[out_dim:].reshape(1, out_dim).astype(jnp.float32)
    if out_p != out_dim:
        colpad = ((0, 0), (0, out_p - out_dim))
        wv = jnp.pad(wv, colpad)
        wg = jnp.pad(wg, colpad)
        bv = jnp.pad(bv, colpad)
        bg = jnp.pad(bg, colpad)
    mxu_dtype = jnp.dtype(mxu_dtype if mxu_dtype is not None else x.dtype)
    x2 = x2.astype(mxu_dtype)
    wv = wv.astype(mxu_dtype)
    wg = wg.astype(mxu_dtype)

    # ---- tile selection ---------------------------------------------------
    block_rows = max(8, _round_up(block_rows, 8))
    tm = block_rows if rows >= block_rows else rows       # full rows if small
    tn = 128
    for cand in (512, 256, 128):                          # divides out_p
        if out_p % cand == 0:
            tn = cand
            break

    x_item = mxu_dtype.itemsize
    o_item = jnp.dtype(out_dtype).itemsize

    def footprint(tm_, tn_, w_bufs):
        x_b = 2 * tm_ * in_dim * x_item                   # x: double-buffered
        w_b = w_bufs * 2 * in_dim * tn_ * x_item          # Wv + Wg tiles
        b_b = w_bufs * 2 * 8 * tn_ * 4                    # biases (sublane pad)
        o_b = 2 * tm_ * tn_ * o_item                      # out: double-buffered
        return x_b + w_b + b_b + o_b

    # Shrink tiles until the single-buffered-weight footprint fits the budget
    # (budget chosen so it also fits v7x's 64 MiB VMEM with headroom).
    while footprint(tm, tn, 1) > vmem_budget_bytes:
        if tn > 128:
            tn //= 2
        elif tm > 8:
            tm = max(8, _round_up(tm // 2, 8))
        else:
            break

    n_tiles = out_p // tn
    row_tiles = pl.cdiv(rows, tm)
    # Give v7x's 2 TensorCores (and v5e/v6e megacore) at least 2 grid steps.
    if n_tiles * row_tiles < 2 and rows >= 16:
        tm = max(8, _round_up((rows + 1) // 2, 8))
        row_tiles = pl.cdiv(rows, tm)

    vmem_limit = int(min(max(int(footprint(tm, tn, 2) * 1.25) + (1 << 20),
                             32 << 20), 56 << 20))
    cost = pl.CostEstimate(
        flops=2 * rows * in_dim * (2 * out_p),
        transcendentals=rows * out_p,                     # one exp per element
        bytes_accessed=int(x2.size * x_item
                           + (wv.size + wg.size) * x_item
                           + (bv.size + bg.size) * 4
                           + rows * out_p * o_item),
    )

    approx_recip = jnp.dtype(out_dtype) == jnp.dtype(jnp.bfloat16)
    kernel = functools.partial(_geglu_kernel, approx_recip=approx_recip)

    def run(single_buffer_weights: bool):
        # Weights/biases are constant over the inner (row) grid axis; single
        # buffering them halves their VMEM footprint.
        res_kw = ({"pipeline_mode": pl.Buffered(1)}
                  if single_buffer_weights else {})
        in_specs = [
            pl.BlockSpec((tm, in_dim), lambda j, i: (i, 0)),            # x
            pl.BlockSpec((in_dim, tn), lambda j, i: (0, j), **res_kw),  # Wv
            pl.BlockSpec((in_dim, tn), lambda j, i: (0, j), **res_kw),  # Wg
            pl.BlockSpec((1, tn), lambda j, i: (0, j), **res_kw),       # bv
            pl.BlockSpec((1, tn), lambda j, i: (0, j), **res_kw),       # bg
        ]
        return pl.pallas_call(
            kernel,
            out_shape=jax.ShapeDtypeStruct((rows, out_p), out_dtype),
            grid=(n_tiles, row_tiles),                    # rows = inner axis
            in_specs=in_specs,
            out_specs=pl.BlockSpec((tm, tn), lambda j, i: (i, j)),
            compiler_params=pltpu.CompilerParams(
                dimension_semantics=("parallel", "parallel"),
                vmem_limit_bytes=vmem_limit),
            cost_estimate=cost,
        )(x2, wv, wg, bv, bg)

    try:
        out = run(single_buffer_weights=True)
    except Exception:
        # TODO(synk): pipeline_mode=pl.Buffered(1) not supported by this jax /
        # libtpu build; fall back to default double-buffering (correctness
        # unaffected, just 2x the weight VMEM).
        out = run(single_buffer_weights=False)

    if out_p != out_dim:
        out = out[:, :out_dim]
    return out.reshape(*lead, out_dim)


# ---------------------------------------------------------------------------
# Pure-JAX reference (exact-erf GELU, matching PyTorch F.gelu default).
# ---------------------------------------------------------------------------
def geglu_reference(x, w, b):
    out_dim = w.shape[1] // 2
    proj = x.astype(jnp.float32) @ w + b
    val, gate = proj[..., :out_dim], proj[..., out_dim:]
    return val * jax.nn.gelu(gate, approximate=False)


def init_params(key, in_dim, out_dim):
    # nn.Linear(in_dim, out_dim*2): U(-1/sqrt(in_dim), 1/sqrt(in_dim))
    kw, kb = jax.random.split(key)
    s = 1.0 / math.sqrt(in_dim)
    w = jax.random.uniform(kw, (in_dim, 2 * out_dim), jnp.float32, -s, s)
    b = jax.random.uniform(kb, (2 * out_dim,), jnp.float32, -s, s)
    return w, b


if __name__ == "__main__":
    B, N = 2, 16          # batch, sequence
    in_dim, out_dim = 32, 32

    key = jax.random.PRNGKey(0)
    kx, kp = jax.random.split(key)
    x = jax.random.normal(kx, (B, N, in_dim), jnp.float32)
    w, b = init_params(kp, in_dim, out_dim)

    y_ref = geglu_reference(x, w, b)

    # 1) f32 MXU path: bit-tight vs the exact-erf reference.
    y_f32 = jax.block_until_ready(geglu_pallas(x, w, b, mxu_dtype=jnp.float32))
    assert y_f32.shape == (B, N, out_dim)
    assert jnp.allclose(y_f32, y_ref, atol=1e-4, rtol=1e-4), "f32 path mismatch"

    # 2) default bf16-MXU path (f32 accumulation + f32 epilogue).
    y_bf = jax.block_until_ready(geglu_pallas(x, w, b))
    assert y_bf.shape == (B, N, out_dim)
    assert jnp.allclose(y_bf, y_ref, atol=2e-2, rtol=2e-2), "bf16-MXU mismatch"

    # 3) bf16 end-to-end (bf16 output -> EUP approx-reciprocal epilogue path).
    y_b16 = jax.block_until_ready(geglu_pallas(x.astype(jnp.bfloat16), w, b))
    assert jnp.allclose(y_b16.astype(jnp.float32), y_ref,
                        atol=5e-2, rtol=5e-2), "bf16 output path mismatch"

    print("KERNEL_OK")
</pallas_src>

<mosaic_0001>
module attributes {stable_mosaic.version = 11 : i64} {
  func.func @_geglu_kernel(%arg0: i32, %arg1: i32, %arg2: memref<16x32xf32, #tpu.memory_space<vmem>>, %arg3: memref<32x128xf32, #tpu.memory_space<vmem>>, %arg4: memref<32x128xf32, #tpu.memory_space<vmem>>, %arg5: memref<1x128xf32, #tpu.memory_space<vmem>>, %arg6: memref<1x128xf32, #tpu.memory_space<vmem>>, %arg7: memref<16x128xf32, #tpu.memory_space<vmem>>) attributes {dimension_semantics = [#tpu.dimension_semantics<parallel>, #tpu.dimension_semantics<parallel>], iteration_bounds = array<i64: 1, 2>, scalar_prefetch = 0 : i64, scratch_operands = 0 : i64, tpu.core_type = #tpu.core_type<tc>, window_params = [{transform_indices = @transform_0, window_bounds = array<i64: 16, 32>}, {pipeline_mode = #tpu.pipeline_mode<synchronous>, transform_indices = @transform_1, window_bounds = array<i64: 32, 128>}, {pipeline_mode = #tpu.pipeline_mode<synchronous>, transform_indices = @transform_2, window_bounds = array<i64: 32, 128>}, {pipeline_mode = #tpu.pipeline_mode<synchronous>, transform_indices = @transform_3, window_bounds = array<i64: 1, 128>}, {pipeline_mode = #tpu.pipeline_mode<synchronous>, transform_indices = @transform_4, window_bounds = array<i64: 1, 128>}, {transform_indices = @transform_5, window_bounds = array<i64: 16, 128>}]} {
    %c0 = arith.constant 0 : index
    %c0_0 = arith.constant 0 : index
    %0 = vector.load %arg2[%c0, %c0_0] : memref<16x32xf32, #tpu.memory_space<vmem>>, vector<16x32xf32>
    %c0_1 = arith.constant 0 : index
    %c0_2 = arith.constant 0 : index
    %1 = vector.load %arg3[%c0_1, %c0_2] : memref<32x128xf32, #tpu.memory_space<vmem>>, vector<32x128xf32>
    %cst = arith.constant dense<0.000000e+00> : vector<16x128xf32>
    %2 = tpu.matmul %0, %1, %cst {dimension_numbers = #tpu.dot_dimension_numbers<[1], [0], [0], [1], [0, 0, 1, 1], [], []>} : vector<16x32xf32>, vector<32x128xf32>, vector<16x128xf32> -> vector<16x128xf32>
    %c0_3 = arith.constant 0 : index
    %c0_4 = arith.constant 0 : index
    %3 = vector.load %arg4[%c0_3, %c0_4] : memref<32x128xf32, #tpu.memory_space<vmem>>, vector<32x128xf32>
    %cst_5 = arith.constant dense<0.000000e+00> : vector<16x128xf32>
    %4 = tpu.matmul %0, %3, %cst_5 {dimension_numbers = #tpu.dot_dimension_numbers<[1], [0], [0], [1], [0, 0, 1, 1], [], []>} : vector<16x32xf32>, vector<32x128xf32>, vector<16x128xf32> -> vector<16x128xf32>
    %c0_6 = arith.constant 0 : index
    %c0_7 = arith.constant 0 : index
    %5 = vector.load %arg5[%c0_6, %c0_7] : memref<1x128xf32, #tpu.memory_space<vmem>>, vector<1x128xf32>
    %6 = vector.broadcast %5 : vector<1x128xf32> to vector<16x128xf32>
    %7 = arith.addf %2, %6 : vector<16x128xf32>
    %c0_8 = arith.constant 0 : index
    %c0_9 = arith.constant 0 : index
    %8 = vector.load %arg6[%c0_8, %c0_9] : memref<1x128xf32, #tpu.memory_space<vmem>>, vector<1x128xf32>
    %9 = vector.broadcast %8 : vector<1x128xf32> to vector<16x128xf32>
    %10 = arith.addf %4, %9 : vector<16x128xf32>
    %cst_10 = arith.constant 0.707106769 : f32
    %11 = vector.broadcast %cst_10 : f32 to vector<16x128xf32>
    %12 = arith.mulf %10, %11 : vector<16x128xf32>
    %13 = math.absf %12 : vector<16x128xf32>
    %cst_11 = arith.constant 0.327591091 : f32
    %14 = vector.broadcast %cst_11 : f32 to vector<16x128xf32>
    %15 = arith.mulf %14, %13 : vector<16x128xf32>
    %cst_12 = arith.constant 1.000000e+00 : f32
    %16 = vector.broadcast %cst_12 : f32 to vector<16x128xf32>
    %17 = arith.addf %16, %15 : vector<16x128xf32>
    %cst_13 = arith.constant 1.000000e+00 : f32
    %18 = vector.broadcast %cst_13 : f32 to vector<16x128xf32>
    %19 = arith.divf %18, %17 : vector<16x128xf32>
    %cst_14 = arith.constant 0.53070271 : f32
    %20 = vector.broadcast %cst_14 : f32 to vector<16x128xf32>
    %21 = arith.mulf %20, %19 : vector<16x128xf32>
    %cst_15 = arith.constant -0.72657603 : f32
    %22 = vector.broadcast %cst_15 : f32 to vector<16x128xf32>
    %23 = arith.addf %21, %22 : vector<16x128xf32>
    %24 = arith.mulf %23, %19 : vector<16x128xf32>
    %cst_16 = arith.constant 0.710706889 : f32
    %25 = vector.broadcast %cst_16 : f32 to vector<16x128xf32>
    %26 = arith.addf %24, %25 : vector<16x128xf32>
    %27 = arith.mulf %26, %19 : vector<16x128xf32>
    %cst_17 = arith.constant -0.142248362 : f32
    %28 = vector.broadcast %cst_17 : f32 to vector<16x128xf32>
    %29 = arith.addf %27, %28 : vector<16x128xf32>
    %30 = arith.mulf %29, %19 : vector<16x128xf32>
    %cst_18 = arith.constant 0.127414793 : f32
    %31 = vector.broadcast %cst_18 : f32 to vector<16x128xf32>
    %32 = arith.addf %30, %31 : vector<16x128xf32>
    %33 = arith.mulf %32, %19 : vector<16x128xf32>
    %cst_19 = arith.constant 0.000000e+00 : f32
    %34 = vector.broadcast %cst_19 : f32 to vector<16x128xf32>
    %35 = arith.subf %34, %13 : vector<16x128xf32>
    %36 = arith.mulf %35, %13 : vector<16x128xf32>
    %37 = math.exp %36 : vector<16x128xf32>
    %38 = arith.mulf %33, %37 : vector<16x128xf32>
    %cst_20 = arith.constant 0.000000e+00 : f32
    %39 = vector.broadcast %cst_20 : f32 to vector<16x128xf32>
    %40 = arith.cmpf oge, %10, %39 : vector<16x128xf32>
    %cst_21 = arith.constant 1.000000e+00 : f32
    %41 = vector.broadcast %cst_21 : f32 to vector<16x128xf32>
    %42 = arith.subf %41, %38 : vector<16x128xf32>
    %43 = arith.select %40, %42, %38 : vector<16x128xi1>, vector<16x128xf32>
    %44 = arith.mulf %7, %10 : vector<16x128xf32>
    %45 = arith.mulf %44, %43 : vector<16x128xf32>
    %c0_22 = arith.constant 0 : index
    %c0_23 = arith.constant 0 : index
    %46 = vector.load %arg7[%c0_22, %c0_23] : memref<16x128xf32, #tpu.memory_space<vmem>>, vector<16x128xf32>
    tpu.vector_store %arg7[%c0_22, %c0_23], %45 {strides = array<i32>} : memref<16x128xf32, #tpu.memory_space<vmem>>, vector<16x128xf32>,
    return
  }
  func.func @transform_0(%arg0: i32, %arg1: i32) -> (i32, i32) {
    %c0_i32 = arith.constant 0 : i32
    %c0_i32_0 = arith.constant 0 : i32
    return %arg1, %c0_i32 : i32, i32
  }
  func.func @transform_1(%arg0: i32, %arg1: i32) -> (i32, i32) {
    %c0_i32 = arith.constant 0 : i32
    %c0_i32_0 = arith.constant 0 : i32
    return %c0_i32, %arg0 : i32, i32
  }
  func.func @transform_2(%arg0: i32, %arg1: i32) -> (i32, i32) {
    %c0_i32 = arith.constant 0 : i32
    %c0_i32_0 = arith.constant 0 : i32
    return %c0_i32, %arg0 : i32, i32
  }
  func.func @transform_3(%arg0: i32, %arg1: i32) -> (i32, i32) {
    %c0_i32 = arith.constant 0 : i32
    %c0_i32_0 = arith.constant 0 : i32
    return %c0_i32, %arg0 : i32, i32
  }
  func.func @transform_4(%arg0: i32, %arg1: i32) -> (i32, i32) {
    %c0_i32 = arith.constant 0 : i32
    %c0_i32_0 = arith.constant 0 : i32
    return %c0_i32, %arg0 : i32, i32
  }
  func.func @transform_5(%arg0: i32, %arg1: i32) -> (i32, i32) {
    %c0_i32 = arith.constant 0 : i32
    return %arg1, %arg0 : i32, i32
  }
}

module attributes {stable_mosaic.version = 11 : i64} {
  func.func @_geglu_kernel(%arg0: i32, %arg1: i32, %arg2: memref<16x32xf32, #tpu.memory_space<vmem>>, %arg3: memref<32x128xf32, #tpu.memory_space<vmem>>, %arg4: memref<32x128xf32, #tpu.memory_space<vmem>>, %arg5: memref<1x128xf32, #tpu.memory_space<vmem>>, %arg6: memref<1x128xf32, #tpu.memory_space<vmem>>, %arg7: memref<16x128xf32, #tpu.memory_space<vmem>>) attributes {dimension_semantics = [#tpu.dimension_semantics<parallel>, #tpu.dimension_semantics<parallel>], iteration_bounds = array<i64: 1, 2>, scalar_prefetch = 0 : i64, scratch_operands = 0 : i64, tpu.core_type = #tpu.core_type<tc>, window_params = [{transform_indices = @transform_0, window_bounds = array<i64: 16, 32>}, {transform_indices = @transform_1, window_bounds = array<i64: 32, 128>}, {transform_indices = @transform_2, window_bounds = array<i64: 32, 128>}, {transform_indices = @transform_3, window_bounds = array<i64: 1, 128>}, {transform_indices = @transform_4, window_bounds = array<i64: 1, 128>}, {transform_indices = @transform_5, window_bounds = array<i64: 16, 128>}]} {
    %c0 = arith.constant 0 : index
    %c0_0 = arith.constant 0 : index
    %0 = vector.load %arg2[%c0, %c0_0] : memref<16x32xf32, #tpu.memory_space<vmem>>, vector<16x32xf32>
    %c0_1 = arith.constant 0 : index
    %c0_2 = arith.constant 0 : index
    %1 = vector.load %arg3[%c0_1, %c0_2] : memref<32x128xf32, #tpu.memory_space<vmem>>, vector<32x128xf32>
    %cst = arith.constant dense<0.000000e+00> : vector<16x128xf32>
    %2 = tpu.matmul %0, %1, %cst {dimension_numbers = #tpu.dot_dimension_numbers<[1], [0], [0], [1], [0, 0, 1, 1], [], []>} : vector<16x32xf32>, vector<32x128xf32>, vector<16x128xf32> -> vector<16x128xf32>
    %c0_3 = arith.constant 0 : index
    %c0_4 = arith.constant 0 : index
    %3 = vector.load %arg4[%c0_3, %c0_4] : memref<32x128xf32, #tpu.memory_space<vmem>>, vector<32x128xf32>
    %cst_5 = arith.constant dense<0.000000e+00> : vector<16x128xf32>
    %4 = tpu.matmul %0, %3, %cst_5 {dimension_numbers = #tpu.dot_dimension_numbers<[1], [0], [0], [1], [0, 0, 1, 1], [], []>} : vector<16x32xf32>, vector<32x128xf32>, vector<16x128xf32> -> vector<16x128xf32>
    %c0_6 = arith.constant 0 : index
    %c0_7 = arith.constant 0 : index
    %5 = vector.load %arg5[%c0_6, %c0_7] : memref<1x128xf32, #tpu.memory_space<vmem>>, vector<1x128xf32>
    %6 = vector.broadcast %5 : vector<1x128xf32> to vector<16x128xf32>
    %7 = arith.addf %2, %6 : vector<16x128xf32>
    %c0_8 = arith.constant 0 : index
    %c0_9 = arith.constant 0 : index
    %8 = vector.load %arg6[%c0_8, %c0_9] : memref<1x128xf32, #tpu.memory_space<vmem>>, vector<1x128xf32>
    %9 = vector.broadcast %8 : vector<1x128xf32> to vector<16x128xf32>
    %10 = arith.addf %4, %9 : vector<16x128xf32>
    %cst_10 = arith.constant 0.707106769 : f32
    %11 = vector.broadcast %cst_10 : f32 to vector<16x128xf32>
    %12 = arith.mulf %10, %11 : vector<16x128xf32>
    %13 = math.absf %12 : vector<16x128xf32>
    %cst_11 = arith.constant 0.327591091 : f32
    %14 = vector.broadcast %cst_11 : f32 to vector<16x128xf32>
    %15 = arith.mulf %14, %13 : vector<16x128xf32>
    %cst_12 = arith.constant 1.000000e+00 : f32
    %16 = vector.broadcast %cst_12 : f32 to vector<16x128xf32>
    %17 = arith.addf %16, %15 : vector<16x128xf32>
    %cst_13 = arith.constant 1.000000e+00 : f32
    %18 = vector.broadcast %cst_13 : f32 to vector<16x128xf32>
    %19 = arith.divf %18, %17 : vector<16x128xf32>
    %cst_14 = arith.constant 0.53070271 : f32
    %20 = vector.broadcast %cst_14 : f32 to vector<16x128xf32>
    %21 = arith.mulf %20, %19 : vector<16x128xf32>
    %cst_15 = arith.constant -0.72657603 : f32
    %22 = vector.broadcast %cst_15 : f32 to vector<16x128xf32>
    %23 = arith.addf %21, %22 : vector<16x128xf32>
    %24 = arith.mulf %23, %19 : vector<16x128xf32>
    %cst_16 = arith.constant 0.710706889 : f32
    %25 = vector.broadcast %cst_16 : f32 to vector<16x128xf32>
    %26 = arith.addf %24, %25 : vector<16x128xf32>
    %27 = arith.mulf %26, %19 : vector<16x128xf32>
    %cst_17 = arith.constant -0.142248362 : f32
    %28 = vector.broadcast %cst_17 : f32 to vector<16x128xf32>
    %29 = arith.addf %27, %28 : vector<16x128xf32>
    %30 = arith.mulf %29, %19 : vector<16x128xf32>
    %cst_18 = arith.constant 0.127414793 : f32
    %31 = vector.broadcast %cst_18 : f32 to vector<16x128xf32>
    %32 = arith.addf %30, %31 : vector<16x128xf32>
    %33 = arith.mulf %32, %19 : vector<16x128xf32>
    %cst_19 = arith.constant 0.000000e+00 : f32
    %34 = vector.broadcast %cst_19 : f32 to vector<16x128xf32>
    %35 = arith.subf %34, %13 : vector<16x128xf32>
    %36 = arith.mulf %35, %13 : vector<16x128xf32>
    %37 = math.exp %36 : vector<16x128xf32>
    %38 = arith.mulf %33, %37 : vector<16x128xf32>
    %cst_20 = arith.constant 0.000000e+00 : f32
    %39 = vector.broadcast %cst_20 : f32 to vector<16x128xf32>
    %40 = arith.cmpf oge, %10, %39 : vector<16x128xf32>
    %cst_21 = arith.constant 1.000000e+00 : f32
    %41 = vector.broadcast %cst_21 : f32 to vector<16x128xf32>
    %42 = arith.subf %41, %38 : vector<16x128xf32>
    %43 = arith.select %40, %42, %38 : vector<16x128xi1>, vector<16x128xf32>
    %44 = arith.mulf %7, %10 : vector<16x128xf32>
    %45 = arith.mulf %44, %43 : vector<16x128xf32>
    %c0_22 = arith.constant 0 : index
    %c0_23 = arith.constant 0 : index
    %46 = vector.load %arg7[%c0_22, %c0_23] : memref<16x128xf32, #tpu.memory_space<vmem>>, vector<16x128xf32>
    tpu.vector_store %arg7[%c0_22, %c0_23], %45 {strides = array<i32>} : memref<16x128xf32, #tpu.memory_space<vmem>>, vector<16x128xf32>,
    return
  }
  func.func @transform_0(%arg0: i32, %arg1: i32) -> (i32, i32) {
    %c0_i32 = arith.constant 0 : i32
    %c0_i32_0 = arith.constant 0 : i32
    return %arg1, %c0_i32 : i32, i32
  }
  func.func @transform_1(%arg0: i32, %arg1: i32) -> (i32, i32) {
    %c0_i32 = arith.constant 0 : i32
    %c0_i32_0 = arith.constant 0 : i32
    return %c0_i32, %arg0 : i32, i32
  }
  func.func @transform_2(%arg0: i32, %arg1: i32) -> (i32, i32) {
    %c0_i32 = arith.constant 0 : i32
    %c0_i32_0 = arith.constant 0 : i32
    return %c0_i32, %arg0 : i32, i32
  }
  func.func @transform_3(%arg0: i32, %arg1: i32) -> (i32, i32) {
    %c0_i32 = arith.constant 0 : i32
    %c0_i32_0 = arith.constant 0 : i32
    return %c0_i32, %arg0 : i32, i32
  }
  func.func @transform_4(%arg0: i32, %arg1: i32) -> (i32, i32) {
    %c0_i32 = arith.constant 0 : i32
    %c0_i32_0 = arith.constant 0 : i32
    return %c0_i32, %arg0 : i32, i32
  }
  func.func @transform_5(%arg0: i32, %arg1: i32) -> (i32, i32) {
    %c0_i32 = arith.constant 0 : i32
    return %arg1, %arg0 : i32, i32
  }
}

</mosaic_0001>

<bundles_post_ra>
// kernel: tpu_custom_call.1
= control target key start
LH: loop header
LB: loop body
LE: loop exit
PB: predicated region body
PF: predicated region fallthrough
CT: control target
= control target key end

     0   :  { %s1153_s0 = inlined_call_operand.hbm [shape: f32[32,32], index: 0, kind: input, shape index: {}]   ;;  %s1154_s1 = inlined_call_operand.hbm [shape: f32[32,128], index: 1, kind: input, shape index: {}]   ;;  %s1155_s2 = inlined_call_operand.hbm [shape: f32[32,128], index: 2, kind: input, shape index: {}]   ;;  %s1156_s3 = inlined_call_operand.vmem [shape: f32[1,128], index: 3, kind: input, shape index: {}]   ;;  %s1157_s4 = inlined_call_operand.vmem [shape: f32[1,128], index: 4, kind: input, shape index: {}]   ;;  %s1158_s5 = inlined_call_operand.hbm [shape: f32[32,128], index: 5, kind: output, shape index: {}]  }
   0x1   :  { %1161 = sst [smem:[#allocation12_spill]] %s1154_s1 }
   0x2   :  { %1162 = sst [smem:[#allocation13_spill]] %s1155_s2 }
   0x3   :  { %10 = vsyncpa [#allocation3], 0 }
   0x4   :  { %12 = vsyncpa [#allocation3 + $0x1], 0 }
   0x5   :  { %13 = vsyncpa [#allocation6], 0 }
   0x6   :  { %14 = vsyncpa [#allocation4], 0 }
   0x7   :  { %16 = vsyncpa [#allocation4 + $0x1], 0  ;;  %s978_s18 = smov 0   ;;  %s980_s19 = smov 0  }
   0x8   :  { %s982_s20 = smov 0   ;;  %s984_s21 = smov 0  }
   0x9   :  { %s986_s22 = smov 0   ;;  %s988_s23 = smov 0  }
   0xa LB: > { %s632_s24 = sadd.s32 4294967295, %s940_s23   ;;  %s633_s25 = sadd.s32 4294967294, %s940_s23   ;;  %s940_s23 = sphi %s988_s23, %s22_s23   ;;  %s936_s22 = sphi %s986_s22, %s1176_s22   ;;  %s932_s21 = sphi %s984_s21, %s1175_s21   ;;  %s928_s20 = sphi %s982_s20, %s1174_s20   ;;  %s924_s19 = sphi %s980_s19, %s1173_s19   ;;  %s920_s18 = sphi %s978_s18, %s1172_s18  }
   0xb   : > { %p54_p0 = scmp.ne.s32.totalorder %s924_s19, %s920_s18  ;;  %p1014_p1 = scmp.eq.s32.totalorder %s632_s24, 0 }
   0xc   : > { %p190_p2 = scmp.eq.s32.totalorder %s633_s25, 1  ;;  %p634_p4 = scmp.ge.s32.totalorder %s940_s23, 1 }
   0xd   : > { %p1020_p3 = por %p1014_p1, %p54_p0  ;;  %p197_p6 = scmp.lt.s32.totalorder %s940_s23, 3 }
   0xe   : > { %p1025_p5 = por %p190_p2, %p54_p0  ;;  %s1166_s1 = sld [smem:[#allocation12_spill]] }
   0xf   : > { %p1033_p7 = pnand %p634_p4, %p197_p6  ;;  %s942_s8 = smov [#allocation5]  }
  0x10   : > { %s212_s9 = sshll.u32 %s942_s8, 4  ;;  %p639_p10 = scmp.ge.s32.totalorder %s940_s23, 2  ;;  %s213_s9 = int_to_ptr.vmem [resolvable:$true] %s212_s9 }
  0x11   : > { %p679_p8 = pneg %p1033_p7  ;;  %s1168_s2 = sld [smem:[#allocation13_spill]] }
  0x12   : > { %s1159_s13 = smov 128   ;;  %s1160_s14 = smov 8  }
  0x13   : > { %p680_p9 = pnand %p679_p8, %p1014_p1  ;;  %s945_s15 = smov [#allocation7]  }
  0x14   : > { %s210_s6 = sshll.u32 %s1166_s1, 4  ;;  %s228_s16 = sshll.u32 %s945_s15, 4  ;;  %s211_s6 = int_to_ptr.hbm [resolvable:$true] %s210_s6  ;;  %s229_s16 = int_to_ptr.vmem [resolvable:$true] %s228_s16 }
  0x15   : > { %682 = dma.hbm_to_vmem [thread:$0]  (!%p680_p9), %s211_s6, 512, %s213_s9, [#allocation6], %s1159_s13, %s1159_s13, %s1160_s14  }
  0x16   : > { %p184_p11 = scmp.eq.s32.totalorder %s632_s24, 1  ;;  %s31_s17 = sadd.s32 1, %s936_s22 }
  0x17   : > { %s226_s12 = sshll.u32 %s1168_s2, 4  ;;  %p32_p12 = scmp.ge.s32.totalorder %s31_s17, 2  ;;  %s227_s12 = int_to_ptr.hbm [resolvable:$true] %s226_s12 }
  0x18   : > { %685 = dma.hbm_to_vmem [thread:$0]  (!%p680_p9), %s227_s12, 512, %s229_s16, [#allocation6], %s1159_s13, %s1159_s13, %s1160_s14  }
  0x19   : > { %s41_s25 = sadd.s32 1, %s928_s20  ;;  %p48_p13 = scmp.ne.s32.totalorder %s928_s20, %s924_s19 }
  0x1a   : > { %p49_p0 = scmp.eq.s32.totalorder %s940_s23, 0  ;;  %s1178_s17 = smov (%p32_p12, %s31_s17), 0 }
  0x1b   : > { %p1060_p2 = por %p184_p11, %p48_p13  ;;  %p696_p4 = scmp.lt.s32.totalorder %s940_s23, 2 }
  0x1c   : > { %s38_s30 = ssub.s32 %s936_s22, %s1178_s17  ;;  %s254_s6 = sand.u32 1, %s928_s20  }
  0x1d   : > { %p39_p6 = scmp.eq.s32.totalorder %s38_s30, 0  ;;  %p50_p8 = por %p49_p0, %p48_p13 }
  0x1e   : > { %s640_s8 = sshll.u32 %s254_s6, 4  ;;  %s657_s24 = sshll.u32 %s936_s22, 4 }
  0x1f   : > { %s1070_s9 = scalar_select %p39_p6, %s928_s20, %s41_s25  }
  0x20   : > { %s263_s12 = scalar_lea.hbm %s1153_s0, %s657_s24  ;;  %s258_s16 = scalar_lea.vmem [#allocation2], %s640_s8 }
  0x21   : > { %s264_s15 = sshll.u32 %s263_s12, 4  ;;  %s266_s13 = sshll.u32 %s258_s16, 4  ;;  %s265_s15 = int_to_ptr.hbm [resolvable:$true] %s264_s15  ;;  %s267_s13 = int_to_ptr.vmem [resolvable:$true] %s266_s13 }
  0x22   : > { %p687_p9 = pnand %p696_p4, %p50_p8  ;;  %s255_s14 = scalar_lea.sflag [#allocation3], %s254_s6 }
  0x23   : > { %s1170_s1 = smov 8   ;;  %s1171_s2 = smov 128  }
  0x24   : > { %689 = dma.hbm_to_vmem [thread:$0]  (!%p687_p9), %s265_s15, 256, %s267_s13, %s255_s14, %s1171_s2, %s1171_s2, %s1170_s1  }
  0x25   : > { %278 = sbr.rel (%p1033_p7) target bundleno = 243 (0xf3), region = 40  ;;  %s1083_s25 = sand.u32 (!%p1033_p7), 1, %s924_s19  }
  0x26   : > { %s644_s30 = sshll.u32 (!%p1033_p7), %s1083_s25, 4  ;;  %s281_s8 = scalar_lea.sflag (!%p1033_p7), [#allocation3], %s1083_s25 }
  0x27   : > { %s284_s24 = scalar_lea.vmem (!%p1033_p7), [#allocation2], %s644_s30 }
  0x2a   : > { %907 = dma.done.wait (%p1020_p3), %s281_s8, 256  }
  0x2b   : > { %909 = vsyncadd (%p1020_p3), %s281_s8, 4294967040 }
  0x2c   : > { %911 = dma.done.wait (%p1014_p1), [#allocation6], 1024  }
  0x2d   : > { %913 = vsyncadd (%p1014_p1), [#allocation6], 4294966272  ;;  %v341_v0 = vld [vmem:[#allocation5 + $0x18] sm:$0xff]  ;;  %v340_v2 = vld [vmem:[#allocation5 + $0x10] sm:$0xff]  ;;  %vm350_vm0 = vcmask 261120   ;;  %s658_s7 = sshll.u32 %s932_s21, 4 }
  0x2e   : > { %v345_v1 = vld [vmem:[#allocation7 + $0x18] sm:$0xff]  ;;  %659 = vmatpush.msra.mxu2 %v341_v0  ;;  %v344_v3 = vld [vmem:[#allocation7 + $0x10] sm:$0xff]  ;;  %v339_v4 = vld [vmem:[#allocation5 + $0x8] sm:$0xff]  ;;  %369 = vmatpush.msra.mxu0 %v341_v0  ;;  %s498_s6 = scalar_lea.hbm %s1158_s5, %s658_s7  ;;  %s327_s10 = scalar_lea.vmem [#allocation8], %s644_s30 }
  0x2f   : > { %396 = vmatpush.msra.mxu1 %v345_v1  ;;  %663 = vmatpush.msra.mxu3 %v345_v1  ;;  %v343_v5 = vld [vmem:[#allocation7 + $0x8] sm:$0xff]  ;;  %v338_v6 = vld [vmem:[#allocation5] sm:$0xff]  ;;  %s499_s21 = sshll.u32 %s327_s10, 4  ;;  %s501_s11 = sshll.u32 %s498_s6, 4  ;;  %s500_s21 = int_to_ptr.vmem [resolvable:$true] %s499_s21  ;;  %s502_s11 = int_to_ptr.hbm [resolvable:$true] %s501_s11 }
  0x30   : > { %660 = vmatpush.msra.mxu2 %v340_v2  ;;  %v342_v7 = vld [vmem:[#allocation7] sm:$0xff]  ;;  %370 = vmatpush.msra.mxu0 %v340_v2  ;;  %v337_v8 = vld [vmem:[%s284_s24 + $0x8] sm:$0xff]  ;;  %s486_s12 = scalar_lea.sflag [#allocation4], %s1083_s25  ;;  %s868_s15 = sshra.s32 %s502_s11, 4  ;;  %s869_s15 = int_to_ptr.hbm [resolvable:$true] %s868_s15 }
  0x31   : > { %397 = vmatpush.msra.mxu1 %v344_v3  ;;  %664 = vmatpush.msra.mxu3 %v344_v3  ;;  %v336_v9 = vld [vmem:[%s284_s24] sm:$0xff]  ;;  %s870_s16 = scalar_lea.hbm %s869_s15, 16  ;;  %s874_s24 = scalar_lea.hbm %s1158_s5, 32 }
  0x32   : > { %661 = vmatpush.msra.mxu2 %v339_v4  ;;  %371 = vmatpush.msra.mxu0 %v339_v4  ;;  %v754_v10 = vld [vmem:[%s1157_s4] ss:$0 sm:$0xff]  ;;  %p871_p1 = scmp.ne.s32.totalorder %s869_s15, %s870_s16  ;;  %p875_p11 = scmp.lt.s32.totalorder %s869_s15, %s1158_s5 }
  0x33   : > { %398 = vmatpush.msra.mxu1 %v343_v5  ;;  %665 = vmatpush.msra.mxu3 %v343_v5  ;;  %v755_v58 = vld [vmem:[%s1156_s3] ss:$0 sm:$0xff]  ;;  %p876_p12 = scmp.lt.s32.totalorder %s874_s24, %s870_s16 }
  0x34   : > { %662 = vmatpush.msra.mxu2 %v338_v6  ;;  %372 = vmatpush.msra.mxu0 %v338_v6  ;;  %p872_p3 = pnand %p871_p1, %p1060_p2 }
  0x35   : > { %399 = vmatpush.msra.mxu1 %v342_v7  ;;  %666 = vmatpush.msra.mxu3 %v342_v7  ;;  %p877_p13 = por %p876_p12, %p875_p11 }
  0x36   : > { %649 = vmatmul.msk.f32.vlgmr.msra.gmra.mxu2 %vm350_vm0, %v337_v8  ;;  %650 = vmatmul.msk.f32.vlgmr.msra.gmra.mxu1 %vm350_vm0, %v336_v9  ;;  %p873_p7 = pneg %p872_p3 }
  0x37   : > { %651 = vmatmul.msk.f32.vlgmr.msra.gmra.mxu3 %vm350_vm0, %v337_v8  ;;  %648 = vmatmul.msk.f32.vlgmr.msra.gmra.mxu0 %vm350_vm0, %v336_v9 }
  0x38   : > { %p878_p0 = pnand %p877_p13, %p873_p7 }
  0xb3   : > { %v401_v11 = vpop.f32.mrf.mxu1 }
  0xb4   : > { %v1100_v12 = vadd.f32 %v754_v10, %v401_v11  ;;  %v374_v60 = vpop.f32.mrf.mxu0 }
  0xb5   : > { %v375_v2 = vadd.f32 %v755_v58, %v374_v60 }
  0xb6   : > { %v407_v13 = vmul.f32 0.70710677, %v1100_v12  ;;  %vm473_vm9 = vcmp.ge.f32.partialorder %v1100_v12, 0.0 }
  0xb7   : > { %v479_v7 = vmul.f32 %v1100_v12, %v375_v2 }
  0xb8   : > { %v409_v14 = vand.u32 2147483647, %v407_v13 }
  0xb9   : > { %v377_v8 = vpop.f32.mrf.mxu2 }
  0xba   : > { %v404_v15 = vpop.f32.mrf.mxu3  ;;  %v411_v16 = vmul.f32 0.3275911, %v409_v14  ;;  %v463_v34 = vsub.f32 0.0, %v409_v14 }
  0xbb   : > { %v1103_v17 = vadd.f32 %v754_v10, %v404_v15  ;;  %v378_v15 = vadd.f32 %v755_v58, %v377_v8 }
  0xbc   : > { %v413_v18 = vadd.f32 1.0, %v411_v16  ;;  %v465_v42 = vmul.f32 %v463_v34, %v409_v14 }
  0xbd   : > { %v408_v19 = vmul.f32 0.70710677, %v1103_v17  ;;  %vm474_vm10 = vcmp.ge.f32.partialorder %v1103_v17, 0.0 }
  0xbe   : > { %756 = vrcp.f32 %v413_v18  ;;  %v426_v26 = vand.u32 2147483648, %v413_v18  ;;  %vm420_vm1 = vweird.f32 %v413_v18  ;;  %v424_v28 = vand.u32 2147483647, %v413_v18 }
  0xbf   : > { %v410_v20 = vand.u32 2147483647, %v408_v19  ;;  %v467_v50 = vmul.f32 1.442695, %v465_v42 }
  0xc0   : > { %v427_v31 = vor.u32 1.1754944e-38, %v426_v26  ;;  %vm425_vm4 = vcmp.eq.f32.partialorder %v424_v28, 8.507059e+37 }
  0xc1   : > { %v412_v21 = vmul.f32 0.3275911, %v410_v20  ;;  %v464_v49 = vsub.f32 0.0, %v410_v20 }
  0xc3   : > { %v414_v22 = vadd.f32 1.0, %v412_v21  ;;  %v466_v55 = vmul.f32 %v464_v49, %v410_v20 }
  0xc4   : > { %v757_v23 = vpop.eup %756 }
  0xc5   : > { %v416_v24 = vmul.f32 %v757_v23, %v413_v18  ;;  %758 = vrcp.f32 %v414_v22  ;;  %vm421_vm2 = vweird.f32 %v757_v23  ;;  %v441_v38 = vand.u32 2147483648, %v414_v22 }
  0xc6   : > { %vm422_vm3 = vmor %vm420_vm1, %vm421_vm2  ;;  %v439_v40 = vand.u32 2147483647, %v414_v22  ;;  %vm435_vm6 = vweird.f32 %v414_v22  ;;  %760 = vpow2.f32 %v467_v50  ;;  %v469_v62 = vmul.f32 1.442695, %v466_v55 }
  0xc7   : > { %v417_v25 = vsub.f32 1.0, %v416_v24  ;;  %v442_v45 = vor.u32 1.1754944e-38, %v441_v38  ;;  %v480_v18 = vmul.f32 %v1103_v17, %v378_v15 }
  0xc8   : > { %vm440_vm8 = vcmp.eq.f32.partialorder %v439_v40, 8.507059e+37  ;;  %762 = vpow2.f32 %v469_v62 }
  0xc9   : > { %v418_v27 = vmul.f32 %v757_v23, %v417_v25 }
  0xcb   : > { %v759_v29 = vpop.eup %758  ;;  %v419_v30 = vadd.f32 %v757_v23, %v418_v27 }
  0xcc   : > { %v431_v32 = vmul.f32 %v759_v29, %v414_v22  ;;  %vm436_vm5 = vweird.f32 %v759_v29  ;;  %v761_v1 = vpop.eup %760 }
  0xcd   : > { %v423_v33 = vsel %vm422_vm3, %v757_v23, %v419_v30  ;;  %vm437_vm7 = vmor %vm435_vm6, %vm436_vm5 }
  0xce   : > { %v428_v35 = vsel %vm425_vm4, %v427_v31, %v423_v33  ;;  %v432_v36 = vsub.f32 1.0, %v431_v32  ;;  %v763_v14 = vpop.eup %762 }
  0xcf   : > { %v445_v37 = vmul.f32 0.5307027, %v428_v35 }
  0xd0   : > { %v433_v39 = vmul.f32 %v759_v29, %v432_v36 }
  0xd1   : > { %v447_v41 = vadd.f32 -0.72657603, %v445_v37 }
  0xd2   : > { %v434_v43 = vadd.f32 %v759_v29, %v433_v39 }
  0xd3   : > { %v449_v44 = vmul.f32 %v447_v41, %v428_v35 }
  0xd4   : > { %v438_v46 = vsel %vm437_vm7, %v759_v29, %v434_v43 }
  0xd5   : > { %v451_v47 = vadd.f32 0.7107069, %v449_v44  ;;  %v443_v48 = vsel %vm440_vm8, %v442_v45, %v438_v46 }
  0xd6   : > { %v446_v51 = vmul.f32 0.5307027, %v443_v48 }
  0xd7   : > { %v453_v52 = vmul.f32 %v451_v47, %v428_v35 }
  0xd8   : > { %v448_v53 = vadd.f32 -0.72657603, %v446_v51 }
  0xd9   : > { %v455_v54 = vadd.f32 -0.14224836, %v453_v52 }
  0xda   : > { %v450_v56 = vmul.f32 %v448_v53, %v443_v48 }
  0xdb   : > { %v457_v57 = vmul.f32 %v455_v54, %v428_v35 }
  0xdc   : > { %v452_v59 = vadd.f32 0.7107069, %v450_v56 }
  0xdd   : > { %v459_v61 = vadd.f32 0.1274148, %v457_v57 }
  0xde   : > { %v454_v63 = vmul.f32 %v452_v59, %v443_v48 }
  0xdf   : > { %v461_v0 = vmul.f32 %v459_v61, %v428_v35 }
  0xe0   : > { %v456_v3 = vadd.f32 -0.14224836, %v454_v63 }
  0xe1   : > { %v471_v4 = vmul.f32 %v761_v1, %v461_v0 }
  0xe2   : > { %v458_v5 = vmul.f32 %v456_v3, %v443_v48 }
  0xe3   : > { %v475_v6 = vsub.f32 1.0, %v471_v4 }
  0xe4   : > { %v460_v9 = vadd.f32 0.1274148, %v458_v5 }
  0xe5   : > { %v477_v10 = vsel %vm473_vm9, %v475_v6, %v471_v4 }
  0xe6   : > { %v481_v11 = vmul.f32 %v479_v7, %v477_v10  ;;  %v462_v13 = vmul.f32 %v460_v9, %v443_v48 }
  0xe8   : > { %483 = vst [vmem:[%s327_s10] sm:$0xff] %v481_v11  ;;  %v472_v16 = vmul.f32 %v763_v14, %v462_v13 }
  0xea   : > { %v476_v12 = vsub.f32 1.0, %v472_v16 }
  0xec   : > { %v478_v19 = vsel %vm474_vm10, %v476_v12, %v472_v16 }
  0xed   : > { %v482_v20 = vmul.f32 %v480_v18, %v478_v19 }
  0xef   : > { %484 = vst [vmem:[%s327_s10 + $0x8] sm:$0xff] %v482_v20 }
  0xf0   : > { %881 = shalt.err (!%p878_p0)
}
  0xf1   : > { %s946_s25 = smov 128   ;;  %s947_s26 = smov 8  }
  0xf2   : > { %677 = dma.vmem_to_hbm [thread:$0]  (%p1060_p2), %s500_s21, 256, %s502_s11, %s486_s12, %s946_s25, %s946_s25, %s947_s26  }
  0xf3 PF: > { %s516_s27 = sand.u32 1, %s920_s18   ;;  %p691_p4 = pnand %p639_p10, %p1025_p5 }
  0xf4   : > { %s517_s7 = scalar_lea.sflag [#allocation4], %s516_s27 }
  0xf5   : > { %p692_p6 = pneg %p691_p4 }
  0xf7   : > { %915 = dma.done.wait (%p692_p6), %s517_s7, 256  }
  0xf8   : > { %917 = vsyncadd (%p692_p6), %s517_s7, 4294967040  ;;  %s22_s23 = sadd.s32 1, %s940_s23   ;;  %s1172_s18 = smov %s924_s19 }
  0xf9   : > { %p19_p8 = scmp.ge.s32.totalorder %s22_s23, 4   ;;  %s1173_s19 = smov %s928_s20 }
  0xfa   : > { %s1174_s20 = smov %s1070_s9  ;;  %s1175_s21 = smov %s936_s22 }
  0xfb   : > { %s1176_s22 = smov %s1178_s17  ;;  %21 = sbr.rel (!%p19_p8) target bundleno = 10 (0xa), region = 101 }
 0x100   :  { %523 = vsyncpa [#allocation3], 1 }
 0x101   :  { %525 = vsyncpa [#allocation3 + $0x1], 1 }
 0x102   :  { %526 = vsyncpa [#allocation6], 1 }
 0x103   :  { %527 = vsyncpa [#allocation4], 1 }
 0x104   :  { %529 = vsyncpa [#allocation4 + $0x1], 1 }

// kernel: tpu_custom_call.1
= control target key start
LH: loop header
LB: loop body
LE: loop exit
PB: predicated region body
PF: predicated region fallthrough
CT: control target
= control target key end

     0   :  { %s1153_s0 = inlined_call_operand.hbm [shape: f32[32,32], index: 0, kind: input, shape index: {}]   ;;  %s1154_s1 = inlined_call_operand.hbm [shape: f32[32,128], index: 1, kind: input, shape index: {}]   ;;  %s1155_s2 = inlined_call_operand.hbm [shape: f32[32,128], index: 2, kind: input, shape index: {}]   ;;  %s1156_s3 = inlined_call_operand.vmem [shape: f32[1,128], index: 3, kind: input, shape index: {}]   ;;  %s1157_s4 = inlined_call_operand.vmem [shape: f32[1,128], index: 4, kind: input, shape index: {}]   ;;  %s1158_s5 = inlined_call_operand.hbm [shape: f32[32,128], index: 5, kind: output, shape index: {}]  }
   0x1   :  { %1161 = sst [smem:[#allocation12_spill]] %s1154_s1 }
   0x2   :  { %1162 = sst [smem:[#allocation13_spill]] %s1155_s2 }
   0x3   :  { %10 = vsyncpa [#allocation3], 0 }
   0x4   :  { %12 = vsyncpa [#allocation3 + $0x1], 0 }
   0x5   :  { %13 = vsyncpa [#allocation6], 0 }
   0x6   :  { %14 = vsyncpa [#allocation4], 0 }
   0x7   :  { %16 = vsyncpa [#allocation4 + $0x1], 0  ;;  %s978_s18 = smov 0   ;;  %s980_s19 = smov 0  }
   0x8   :  { %s982_s20 = smov 0   ;;  %s984_s21 = smov 0  }
   0x9   :  { %s986_s22 = smov 0   ;;  %s988_s23 = smov 0  }
   0xa LB: > { %s632_s24 = sadd.s32 4294967295, %s940_s23   ;;  %s633_s25 = sadd.s32 4294967294, %s940_s23   ;;  %s940_s23 = sphi %s988_s23, %s22_s23   ;;  %s936_s22 = sphi %s986_s22, %s1176_s22   ;;  %s932_s21 = sphi %s984_s21, %s1175_s21   ;;  %s928_s20 = sphi %s982_s20, %s1174_s20   ;;  %s924_s19 = sphi %s980_s19, %s1173_s19   ;;  %s920_s18 = sphi %s978_s18, %s1172_s18  }
   0xb   : > { %p54_p0 = scmp.ne.s32.totalorder %s924_s19, %s920_s18  ;;  %p1014_p1 = scmp.eq.s32.totalorder %s632_s24, 0 }
   0xc   : > { %p190_p2 = scmp.eq.s32.totalorder %s633_s25, 1  ;;  %p634_p4 = scmp.ge.s32.totalorder %s940_s23, 1 }
   0xd   : > { %p1020_p3 = por %p1014_p1, %p54_p0  ;;  %p197_p6 = scmp.lt.s32.totalorder %s940_s23, 3 }
   0xe   : > { %p1025_p5 = por %p190_p2, %p54_p0  ;;  %s1166_s1 = sld [smem:[#allocation12_spill]] }
   0xf   : > { %p1033_p7 = pnand %p634_p4, %p197_p6  ;;  %s942_s8 = smov [#allocation5]  }
  0x10   : > { %s212_s9 = sshll.u32 %s942_s8, 4  ;;  %p639_p10 = scmp.ge.s32.totalorder %s940_s23, 2  ;;  %s213_s9 = int_to_ptr.vmem [resolvable:$true] %s212_s9 }
  0x11   : > { %p679_p8 = pneg %p1033_p7  ;;  %s1168_s2 = sld [smem:[#allocation13_spill]] }
  0x12   : > { %s1159_s13 = smov 128   ;;  %s1160_s14 = smov 8  }
  0x13   : > { %p680_p9 = pnand %p679_p8, %p1014_p1  ;;  %s945_s15 = smov [#allocation7]  }
  0x14   : > { %s210_s6 = sshll.u32 %s1166_s1, 4  ;;  %s228_s16 = sshll.u32 %s945_s15, 4  ;;  %s211_s6 = int_to_ptr.hbm [resolvable:$true] %s210_s6  ;;  %s229_s16 = int_to_ptr.vmem [resolvable:$true] %s228_s16 }
  0x15   : > { %682 = dma.hbm_to_vmem [thread:$0]  (!%p680_p9), %s211_s6, 512, %s213_s9, [#allocation6], %s1159_s13, %s1159_s13, %s1160_s14  }
  0x16   : > { %p184_p11 = scmp.eq.s32.totalorder %s632_s24, 1  ;;  %s31_s17 = sadd.s32 1, %s936_s22 }
  0x17   : > { %s226_s12 = sshll.u32 %s1168_s2, 4  ;;  %p32_p12 = scmp.ge.s32.totalorder %s31_s17, 2  ;;  %s227_s12 = int_to_ptr.hbm [resolvable:$true] %s226_s12 }
  0x18   : > { %685 = dma.hbm_to_vmem [thread:$0]  (!%p680_p9), %s227_s12, 512, %s229_s16, [#allocation6], %s1159_s13, %s1159_s13, %s1160_s14  }
  0x19   : > { %s41_s25 = sadd.s32 1, %s928_s20  ;;  %p48_p13 = scmp.ne.s32.totalorder %s928_s20, %s924_s19 }
  0x1a   : > { %p49_p0 = scmp.eq.s32.totalorder %s940_s23, 0  ;;  %s1178_s17 = smov (%p32_p12, %s31_s17), 0 }
  0x1b   : > { %p1060_p2 = por %p184_p11, %p48_p13  ;;  %p696_p4 = scmp.lt.s32.totalorder %s940_s23, 2 }
  0x1c   : > { %s38_s30 = ssub.s32 %s936_s22, %s1178_s17  ;;  %s254_s6 = sand.u32 1, %s928_s20  }
  0x1d   : > { %p39_p6 = scmp.eq.s32.totalorder %s38_s30, 0  ;;  %p50_p8 = por %p49_p0, %p48_p13 }
  0x1e   : > { %s640_s8 = sshll.u32 %s254_s6, 4  ;;  %s657_s24 = sshll.u32 %s936_s22, 4 }
  0x1f   : > { %s1070_s9 = scalar_select %p39_p6, %s928_s20, %s41_s25  }
  0x20   : > { %s263_s12 = scalar_lea.hbm %s1153_s0, %s657_s24  ;;  %s258_s16 = scalar_lea.vmem [#allocation2], %s640_s8 }
  0x21   : > { %s264_s15 = sshll.u32 %s263_s12, 4  ;;  %s266_s13 = sshll.u32 %s258_s16, 4  ;;  %s265_s15 = int_to_ptr.hbm [resolvable:$true] %s264_s15  ;;  %s267_s13 = int_to_ptr.vmem [resolvable:$true] %s266_s13 }
  0x22   : > { %p687_p9 = pnand %p696_p4, %p50_p8  ;;  %s255_s14 = scalar_lea.sflag [#allocation3], %s254_s6 }
  0x23   : > { %s1170_s1 = smov 8   ;;  %s1171_s2 = smov 128  }
  0x24   : > { %689 = dma.hbm_to_vmem [thread:$0]  (!%p687_p9), %s265_s15, 256, %s267_s13, %s255_s14, %s1171_s2, %s1171_s2, %s1170_s1  }
  0x25   : > { %278 = sbr.rel (%p1033_p7) target bundleno = 243 (0xf3), region = 40  ;;  %s1083_s25 = sand.u32 (!%p1033_p7), 1, %s924_s19  }
  0x26   : > { %s644_s30 = sshll.u32 (!%p1033_p7), %s1083_s25, 4  ;;  %s281_s8 = scalar_lea.sflag (!%p1033_p7), [#allocation3], %s1083_s25 }
  0x27   : > { %s284_s24 = scalar_lea.vmem (!%p1033_p7), [#allocation2], %s644_s30 }
  0x2a   : > { %907 = dma.done.wait (%p1020_p3), %s281_s8, 256  }
  0x2b   : > { %909 = vsyncadd (%p1020_p3), %s281_s8, 4294967040 }
  0x2c   : > { %911 = dma.done.wait (%p1014_p1), [#allocation6], 1024  }
  0x2d   : > { %913 = vsyncadd (%p1014_p1), [#allocation6], 4294966272  ;;  %v341_v0 = vld [vmem:[#allocation5 + $0x18] sm:$0xff]  ;;  %v340_v2 = vld [vmem:[#allocation5 + $0x10] sm:$0xff]  ;;  %vm350_vm0 = vcmask 261120   ;;  %s658_s7 = sshll.u32 %s932_s21, 4 }
  0x2e   : > { %v345_v1 = vld [vmem:[#allocation7 + $0x18] sm:$0xff]  ;;  %659 = vmatpush.msra.mxu2 %v341_v0  ;;  %v344_v3 = vld [vmem:[#allocation7 + $0x10] sm:$0xff]  ;;  %v339_v4 = vld [vmem:[#allocation5 + $0x8] sm:$0xff]  ;;  %369 = vmatpush.msra.mxu0 %v341_v0  ;;  %s498_s6 = scalar_lea.hbm %s1158_s5, %s658_s7  ;;  %s327_s10 = scalar_lea.vmem [#allocation8], %s644_s30 }
  0x2f   : > { %396 = vmatpush.msra.mxu1 %v345_v1  ;;  %663 = vmatpush.msra.mxu3 %v345_v1  ;;  %v343_v5 = vld [vmem:[#allocation7 + $0x8] sm:$0xff]  ;;  %v338_v6 = vld [vmem:[#allocation5] sm:$0xff]  ;;  %s499_s21 = sshll.u32 %s327_s10, 4  ;;  %s501_s11 = sshll.u32 %s498_s6, 4  ;;  %s500_s21 = int_to_ptr.vmem [resolvable:$true] %s499_s21  ;;  %s502_s11 = int_to_ptr.hbm [resolvable:$true] %s501_s11 }
  0x30   : > { %660 = vmatpush.msra.mxu2 %v340_v2  ;;  %v342_v7 = vld [vmem:[#allocation7] sm:$0xff]  ;;  %370 = vmatpush.msra.mxu0 %v340_v2  ;;  %v337_v8 = vld [vmem:[%s284_s24 + $0x8] sm:$0xff]  ;;  %s486_s12 = scalar_lea.sflag [#allocation4], %s1083_s25  ;;  %s868_s15 = sshra.s32 %s502_s11, 4  ;;  %s869_s15 = int_to_ptr.hbm [resolvable:$true] %s868_s15 }
  0x31   : > { %397 = vmatpush.msra.mxu1 %v344_v3  ;;  %664 = vmatpush.msra.mxu3 %v344_v3  ;;  %v336_v9 = vld [vmem:[%s284_s24] sm:$0xff]  ;;  %s870_s16 = scalar_lea.hbm %s869_s15, 16  ;;  %s874_s24 = scalar_lea.hbm %s1158_s5, 32 }
  0x32   : > { %661 = vmatpush.msra.mxu2 %v339_v4  ;;  %371 = vmatpush.msra.mxu0 %v339_v4  ;;  %v754_v10 = vld [vmem:[%s1157_s4] ss:$0 sm:$0xff]  ;;  %p871_p1 = scmp.ne.s32.totalorder %s869_s15, %s870_s16  ;;  %p875_p11 = scmp.lt.s32.totalorder %s869_s15, %s1158_s5 }
  0x33   : > { %398 = vmatpush.msra.mxu1 %v343_v5  ;;  %665 = vmatpush.msra.mxu3 %v343_v5  ;;  %v755_v58 = vld [vmem:[%s1156_s3] ss:$0 sm:$0xff]  ;;  %p876_p12 = scmp.lt.s32.totalorder %s874_s24, %s870_s16 }
  0x34   : > { %662 = vmatpush.msra.mxu2 %v338_v6  ;;  %372 = vmatpush.msra.mxu0 %v338_v6  ;;  %p872_p3 = pnand %p871_p1, %p1060_p2 }
  0x35   : > { %399 = vmatpush.msra.mxu1 %v342_v7  ;;  %666 = vmatpush.msra.mxu3 %v342_v7  ;;  %p877_p13 = por %p876_p12, %p875_p11 }
  0x36   : > { %649 = vmatmul.msk.f32.vlgmr.msra.gmra.mxu2 %vm350_vm0, %v337_v8  ;;  %650 = vmatmul.msk.f32.vlgmr.msra.gmra.mxu1 %vm350_vm0, %v336_v9  ;;  %p873_p7 = pneg %p872_p3 }
  0x37   : > { %651 = vmatmul.msk.f32.vlgmr.msra.gmra.mxu3 %vm350_vm0, %v337_v8  ;;  %648 = vmatmul.msk.f32.vlgmr.msra.gmra.mxu0 %vm350_vm0, %v336_v9 }
  0x38   : > { %p878_p0 = pnand %p877_p13, %p873_p7 }
  0xb3   : > { %v401_v11 = vpop.f32.mrf.mxu1 }
  0xb4   : > { %v1100_v12 = vadd.f32 %v754_v10, %v401_v11  ;;  %v374_v60 = vpop.f32.mrf.mxu0 }
  0xb5   : > { %v375_v2 = vadd.f32 %v755_v58, %v374_v60 }
  0xb6   : > { %v407_v13 = vmul.f32 0.70710677, %v1100_v12  ;;  %vm473_vm9 = vcmp.ge.f32.partialorder %v1100_v12, 0.0 }
  0xb7   : > { %v479_v7 = vmul.f32 %v1100_v12, %v375_v2 }
  0xb8   : > { %v409_v14 = vand.u32 2147483647, %v407_v13 }
  0xb9   : > { %v377_v8 = vpop.f32.mrf.mxu2 }
  0xba   : > { %v404_v15 = vpop.f32.mrf.mxu3  ;;  %v411_v16 = vmul.f32 0.3275911, %v409_v14  ;;  %v463_v34 = vsub.f32 0.0, %v409_v14 }
  0xbb   : > { %v1103_v17 = vadd.f32 %v754_v10, %v404_v15  ;;  %v378_v15 = vadd.f32 %v755_v58, %v377_v8 }
  0xbc   : > { %v413_v18 = vadd.f32 1.0, %v411_v16  ;;  %v465_v42 = vmul.f32 %v463_v34, %v409_v14 }
  0xbd   : > { %v408_v19 = vmul.f32 0.70710677, %v1103_v17  ;;  %vm474_vm10 = vcmp.ge.f32.partialorder %v1103_v17, 0.0 }
  0xbe   : > { %756 = vrcp.f32 %v413_v18  ;;  %v426_v26 = vand.u32 2147483648, %v413_v18  ;;  %vm420_vm1 = vweird.f32 %v413_v18  ;;  %v424_v28 = vand.u32 2147483647, %v413_v18 }
  0xbf   : > { %v410_v20 = vand.u32 2147483647, %v408_v19  ;;  %v467_v50 = vmul.f32 1.442695, %v465_v42 }
  0xc0   : > { %v427_v31 = vor.u32 1.1754944e-38, %v426_v26  ;;  %vm425_vm4 = vcmp.eq.f32.partialorder %v424_v28, 8.507059e+37 }
  0xc1   : > { %v412_v21 = vmul.f32 0.3275911, %v410_v20  ;;  %v464_v49 = vsub.f32 0.0, %v410_v20 }
  0xc3   : > { %v414_v22 = vadd.f32 1.0, %v412_v21  ;;  %v466_v55 = vmul.f32 %v464_v49, %v410_v20 }
  0xc4   : > { %v757_v23 = vpop.eup %756 }
  0xc5   : > { %v416_v24 = vmul.f32 %v757_v23, %v413_v18  ;;  %758 = vrcp.f32 %v414_v22  ;;  %vm421_vm2 = vweird.f32 %v757_v23  ;;  %v441_v38 = vand.u32 2147483648, %v414_v22 }
  0xc6   : > { %vm422_vm3 = vmor %vm420_vm1, %vm421_vm2  ;;  %v439_v40 = vand.u32 2147483647, %v414_v22  ;;  %vm435_vm6 = vweird.f32 %v414_v22  ;;  %760 = vpow2.f32 %v467_v50  ;;  %v469_v62 = vmul.f32 1.442695, %v466_v55 }
  0xc7   : > { %v417_v25 = vsub.f32 1.0, %v416_v24  ;;  %v442_v45 = vor.u32 1.1754944e-38, %v441_v38  ;;  %v480_v18 = vmul.f32 %v1103_v17, %v378_v15 }
  0xc8   : > { %vm440_vm8 = vcmp.eq.f32.partialorder %v439_v40, 8.507059e+37  ;;  %762 = vpow2.f32 %v469_v62 }
  0xc9   : > { %v418_v27 = vmul.f32 %v757_v23, %v417_v25 }
  0xcb   : > { %v759_v29 = vpop.eup %758  ;;  %v419_v30 = vadd.f32 %v757_v23, %v418_v27 }
  0xcc   : > { %v431_v32 = vmul.f32 %v759_v29, %v414_v22  ;;  %vm436_vm5 = vweird.f32 %v759_v29  ;;  %v761_v1 = vpop.eup %760 }
  0xcd   : > { %v423_v33 = vsel %vm422_vm3, %v757_v23, %v419_v30  ;;  %vm437_vm7 = vmor %vm435_vm6, %vm436_vm5 }
  0xce   : > { %v428_v35 = vsel %vm425_vm4, %v427_v31, %v423_v33  ;;  %v432_v36 = vsub.f32 1.0, %v431_v32  ;;  %v763_v14 = vpop.eup %762 }
  0xcf   : > { %v445_v37 = vmul.f32 0.5307027, %v428_v35 }
  0xd0   : > { %v433_v39 = vmul.f32 %v759_v29, %v432_v36 }
  0xd1   : > { %v447_v41 = vadd.f32 -0.72657603, %v445_v37 }
  0xd2   : > { %v434_v43 = vadd.f32 %v759_v29, %v433_v39 }
  0xd3   : > { %v449_v44 = vmul.f32 %v447_v41, %v428_v35 }
  0xd4   : > { %v438_v46 = vsel %vm437_vm7, %v759_v29, %v434_v43 }
  0xd5   : > { %v451_v47 = vadd.f32 0.7107069, %v449_v44  ;;  %v443_v48 = vsel %vm440_vm8, %v442_v45, %v438_v46 }
  0xd6   : > { %v446_v51 = vmul.f32 0.5307027, %v443_v48 }
  0xd7   : > { %v453_v52 = vmul.f32 %v451_v47, %v428_v35 }
  0xd8   : > { %v448_v53 = vadd.f32 -0.72657603, %v446_v51 }
  0xd9   : > { %v455_v54 = vadd.f32 -0.14224836, %v453_v52 }
  0xda   : > { %v450_v56 = vmul.f32 %v448_v53, %v443_v48 }
  0xdb   : > { %v457_v57 = vmul.f32 %v455_v54, %v428_v35 }
  0xdc   : > { %v452_v59 = vadd.f32 0.7107069, %v450_v56 }
  0xdd   : > { %v459_v61 = vadd.f32 0.1274148, %v457_v57 }
  0xde   : > { %v454_v63 = vmul.f32 %v452_v59, %v443_v48 }
  0xdf   : > { %v461_v0 = vmul.f32 %v459_v61, %v428_v35 }
  0xe0   : > { %v456_v3 = vadd.f32 -0.14224836, %v454_v63 }
  0xe1   : > { %v471_v4 = vmul.f32 %v761_v1, %v461_v0 }
  0xe2   : > { %v458_v5 = vmul.f32 %v456_v3, %v443_v48 }
  0xe3   : > { %v475_v6 = vsub.f32 1.0, %v471_v4 }
  0xe4   : > { %v460_v9 = vadd.f32 0.1274148, %v458_v5 }
  0xe5   : > { %v477_v10 = vsel %vm473_vm9, %v475_v6, %v471_v4 }
  0xe6   : > { %v481_v11 = vmul.f32 %v479_v7, %v477_v10  ;;  %v462_v13 = vmul.f32 %v460_v9, %v443_v48 }
  0xe8   : > { %483 = vst [vmem:[%s327_s10] sm:$0xff] %v481_v11  ;;  %v472_v16 = vmul.f32 %v763_v14, %v462_v13 }
  0xea   : > { %v476_v12 = vsub.f32 1.0, %v472_v16 }
  0xec   : > { %v478_v19 = vsel %vm474_vm10, %v476_v12, %v472_v16 }
  0xed   : > { %v482_v20 = vmul.f32 %v480_v18, %v478_v19 }
  0xef   : > { %484 = vst [vmem:[%s327_s10 + $0x8] sm:$0xff] %v482_v20 }
  0xf0   : > { %881 = shalt.err (!%p878_p0)
}
  0xf1   : > { %s946_s25 = smov 128   ;;  %s947_s26 = smov 8  }
  0xf2   : > { %677 = dma.vmem_to_hbm [thread:$0]  (%p1060_p2), %s500_s21, 256, %s502_s11, %s486_s12, %s946_s25, %s946_s25, %s947_s26  }
  0xf3 PF: > { %s516_s27 = sand.u32 1, %s920_s18   ;;  %p691_p4 = pnand %p639_p10, %p1025_p5 }
  0xf4   : > { %s517_s7 = scalar_lea.sflag [#allocation4], %s516_s27 }
  0xf5   : > { %p692_p6 = pneg %p691_p4 }
  0xf7   : > { %915 = dma.done.wait (%p692_p6), %s517_s7, 256  }
  0xf8   : > { %917 = vsyncadd (%p692_p6), %s517_s7, 4294967040  ;;  %s22_s23 = sadd.s32 1, %s940_s23   ;;  %s1172_s18 = smov %s924_s19 }
  0xf9   : > { %p19_p8 = scmp.ge.s32.totalorder %s22_s23, 4   ;;  %s1173_s19 = smov %s928_s20 }
  0xfa   : > { %s1174_s20 = smov %s1070_s9  ;;  %s1175_s21 = smov %s936_s22 }
  0xfb   : > { %s1176_s22 = smov %s1178_s17  ;;  %21 = sbr.rel (!%p19_p8) target bundleno = 10 (0xa), region = 101 }
 0x100   :  { %523 = vsyncpa [#allocation3], 1 }
 0x101   :  { %525 = vsyncpa [#allocation3 + $0x1], 1 }
 0x102   :  { %526 = vsyncpa [#allocation6], 1 }
 0x103   :  { %527 = vsyncpa [#allocation4], 1 }
 0x104   :  { %529 = vsyncpa [#allocation4 + $0x1], 1 }

</bundles_post_ra>
